<compile_context>
chip_gen: v7x
topology: tpu7x:2x2x1
jax: 0.10.0
libtpu: 0.0.40
codegen_flags: <defaults>
</compile_context>

<pallas_src>
import jax
import jax.numpy as jnp
from jax.experimental import pallas as pl
from jax.experimental.pallas import tpu as pltpu


_SMALL_BYTES = 256 * 1024               # below this: plain XLA fast path
_TARGET_BLOCK_BYTES = 4 * 1024 * 1024   # ~4 MiB per VMEM buffer (roofline plateau)
_LANE_CANDIDATES = (2048, 1024, 512, 256, 128)
_MIN_LANES = 128                        # vreg lane width


def _round_up(x, m):
    return ((x + m - 1) // m) * m


# ---------------------------------------------------------------------------
# Backward kernel: elementwise scale by -lambda_ (lambda_ read from SMEM)
# ---------------------------------------------------------------------------
def _neg_scale_kernel(lam_ref, g_ref, o_ref):
    # lam_ref: (1,) f32 in SMEM. Cast once to the gradient dtype so bf16/f16
    # cotangents stay un-promoted; one VPU multiply per vreg.
    neg_lam = (-lam_ref[0]).astype(o_ref.dtype)
    o_ref[...] = g_ref[...] * neg_lam


def _neg_scale(g, lambda_):
    """(-lambda_) * g via a tiled, lane-dense, pipelined Pallas kernel."""
    lam = jnp.asarray(lambda_, dtype=jnp.float32)
    orig_shape = g.shape
    total = int(g.size)
    itemsize = jnp.dtype(g.dtype).itemsize

    if total == 0:
        return g

    # Small tensors: custom-call + grid-launch overhead dominates; let XLA
    # fuse the scale into whatever produced g.
    if total * itemsize < _SMALL_BYTES:
        return g * (-lam).astype(g.dtype)

    # Widest lane dimension (multiple of 128) that divides the element count.
    lanes = _MIN_LANES
    for cand in _LANE_CANDIDATES:
        if total % cand == 0:
            lanes = cand
            break

    gflat = g.reshape(-1)
    padded_total = _round_up(total, lanes)
    needs_pad = padded_total != total
    if needs_pad:
        # Rare (element count not a multiple of 128); pads at most lanes-1
        # elements of the flat view.
        gflat = jnp.pad(gflat, (0, padded_total - total))
    rows = padded_total // lanes
    g2d = gflat.reshape(rows, lanes)

    # Byte-sized block; sublane rounding per dtype (f32:8, bf16:16, int8:32).
    sublane = max(8, 32 // itemsize)
    target_rows = max(
        sublane,
        (_TARGET_BLOCK_BYTES // (lanes * itemsize)) // sublane * sublane,
    )
    # Don't allocate a block larger than the (sublane-rounded) array; Pallas
    # handles the ragged trailing block, so rows need NOT be a multiple of
    # block_rows.
    block_rows = min(target_rows, _round_up(rows, sublane))
    grid = (pl.cdiv(rows, block_rows),)

    lam_smem = lam.reshape((1,))

    out2d = pl.pallas_call(
        _neg_scale_kernel,
        out_shape=jax.ShapeDtypeStruct((rows, lanes), g2d.dtype),
        grid=grid,
        in_specs=[
            pl.BlockSpec(memory_space=pltpu.MemorySpace.SMEM),      # lambda_
            pl.BlockSpec((block_rows, lanes), lambda i: (i, 0)),    # grad in
        ],
        out_specs=pl.BlockSpec((block_rows, lanes), lambda i: (i, 0)),
        input_output_aliases={1: 0},
        compiler_params=pltpu.CompilerParams(
            dimension_semantics=("parallel",),
            vmem_limit_bytes=32 * 1024 * 1024,
        ),
    )(lam_smem, g2d)

    out = out2d.reshape(-1)
    if needs_pad:
        out = out[:total]
    return out.reshape(orig_shape)


# ---------------------------------------------------------------------------
# GRL with custom VJP (identity forward, reversed gradient backward)
# ---------------------------------------------------------------------------
@jax.custom_vjp
def _grl(x, lambda_):
    return x  # forward is a semantic identity — no kernel, no HBM traffic


def _grl_fwd(x, lambda_):
    return x, lambda_


def _grl_bwd(lambda_, g):
    # lambda_ gets a zero cotangent (matches PyTorch's "return ..., None").
    return _neg_scale(g, lambda_), jnp.zeros_like(lambda_)


_grl.defvjp(_grl_fwd, _grl_bwd)


def grl(x, lambda_=1.0):
    """Gradient Reversal Layer: identity forward, -lambda_ * grad backward."""
    return _grl(x, jnp.asarray(lambda_, dtype=jnp.float32))


# ---------------------------------------------------------------------------
# Module-like wrapper (mirrors the PyTorch GRL module; no parameters)
# ---------------------------------------------------------------------------
class GRL:
    def __init__(self, lambda_=1.0):
        self.lambda_ = lambda_

    def __call__(self, x):
        return grl(x, self.lambda_)


if __name__ == "__main__":
    key = jax.random.PRNGKey(0)
    k1, k2, k3 = jax.random.split(key, 3)

    model = GRL(lambda_=1.0)

    # --- Spec-sized NCHW input: identity forward + small-grad fast path. ---
    x = jax.random.normal(k1, (2, 4, 16, 16), dtype=jnp.float32)
    y = jax.block_until_ready(model(x))
    assert y.shape == x.shape and y.dtype == x.dtype
    assert jnp.allclose(y, x), "forward of GRL must be identity"

    gx = jax.block_until_ready(jax.grad(lambda t: jnp.sum(grl(t, 1.0) * 2.0))(x))
    assert gx.shape == x.shape and gx.dtype == x.dtype
    assert jnp.allclose(gx, -2.0 * jnp.ones_like(x)), "gradient must be reversed"

    # --- Larger input: exercises the Pallas backward kernel (wide lanes). ---
    xb = jax.random.normal(k2, (4, 8, 64, 128), dtype=jnp.float32)  # 1 MiB
    gb = jax.block_until_ready(
        jax.grad(lambda t: jnp.sum(grl(t, 0.75) * 3.0))(xb))
    assert gb.shape == xb.shape and gb.dtype == xb.dtype
    assert jnp.allclose(gb, -0.75 * 3.0 * jnp.ones_like(xb)), "lambda scaling wrong"

    # --- Awkward size (not a multiple of 128): padded Pallas path. ---
    xc = jax.random.normal(k3, (3, 5, 77, 130), dtype=jnp.float32)
    gc = jax.block_until_ready(jax.grad(lambda t: jnp.sum(grl(t, 0.5)))(xc))
    assert jnp.allclose(gc, -0.5 * jnp.ones_like(xc)), "padded path wrong"

    # --- bf16 cotangent keeps its dtype (16-sublane block rounding). ---
    xd = jax.random.normal(k1, (2, 8, 64, 128), dtype=jnp.bfloat16)
    gd = jax.block_until_ready(
        jax.grad(lambda t: jnp.sum(grl(t, 2.0).astype(jnp.float32)))(xd))
    assert gd.dtype == jnp.bfloat16
    assert jnp.allclose(gd.astype(jnp.float32), -2.0 * jnp.ones(xd.shape)), \
        "bf16 gradient reversal wrong"

    print("KERNEL_OK")
</pallas_src>

<mosaic_0001>
module attributes {stable_mosaic.version = 11 : i64} {
  func.func @_neg_scale_kernel(%arg0: i32, %arg1: memref<1xf32, #tpu.memory_space<smem>>, %arg2: memref<128x2048xf32, #tpu.memory_space<vmem>>, %arg3: memref<128x2048xf32, #tpu.memory_space<vmem>>) attributes {dimension_semantics = [#tpu.dimension_semantics<parallel>], iteration_bounds = array<i64: 1>, scalar_prefetch = 0 : i64, scratch_operands = 0 : i64, tpu.core_type = #tpu.core_type<tc>, window_params = [{transform_indices = @transform_0, window_bounds = array<i64: 1>}, {transform_indices = @transform_1, window_bounds = array<i64: 128, 2048>}, {transform_indices = @transform_2, window_bounds = array<i64: 128, 2048>}]} {
    %c0 = arith.constant 0 : index
    %0 = memref.load %arg1[%c0] : memref<1xf32, #tpu.memory_space<smem>>
    %cst = arith.constant 0.000000e+00 : f32
    %1 = arith.subf %cst, %0 : f32
    %c0_0 = arith.constant 0 : index
    %c0_1 = arith.constant 0 : index
    %2 = vector.load %arg2[%c0_0, %c0_1] : memref<128x2048xf32, #tpu.memory_space<vmem>>, vector<128x2048xf32>
    %3 = vector.broadcast %1 : f32 to vector<128x2048xf32>
    %4 = arith.mulf %2, %3 : vector<128x2048xf32>
    %c0_2 = arith.constant 0 : index
    %c0_3 = arith.constant 0 : index
    %5 = vector.load %arg3[%c0_2, %c0_3] : memref<128x2048xf32, #tpu.memory_space<vmem>>, vector<128x2048xf32>
    tpu.vector_store %arg3[%c0_2, %c0_3], %4 {strides = array<i32>} : memref<128x2048xf32, #tpu.memory_space<vmem>>, vector<128x2048xf32>,
    return
  }
  func.func @transform_0(%arg0: i32) -> i32 {
    %c0_i32 = arith.constant 0 : i32
    %c0_i32_0 = arith.constant 0 : i32
    return %c0_i32 : i32
  }
  func.func @transform_1(%arg0: i32) -> (i32, i32) {
    %c0_i32 = arith.constant 0 : i32
    %c0_i32_0 = arith.constant 0 : i32
    return %arg0, %c0_i32 : i32, i32
  }
  func.func @transform_2(%arg0: i32) -> (i32, i32) {
    %c0_i32 = arith.constant 0 : i32
    %c0_i32_0 = arith.constant 0 : i32
    return %arg0, %c0_i32 : i32, i32
  }
}

</mosaic_0001>

<bundles_post_ra>
// kernel: tpu_custom_call.1
= control target key start
LH: loop header
LB: loop body
LE: loop exit
PB: predicated region body
PF: predicated region fallthrough
CT: control target
= control target key end

     0   :  { %8 = vsyncpa [#allocation4], 0  ;;  %s1177_s0 = inlined_call_operand.<no memory space> [shape: f32[1], index: 0, kind: input, shape index: {}]   ;;  %s1178_s1 = inlined_call_operand.hbm [shape: f32[128,2048], index: 1, kind: input, shape index: {}, may-alias: {1,2}]   ;;  %s1179_s2 = inlined_call_operand.hbm [shape: f32[128,2048], index: 2, kind: output, shape index: {}, may-alias: {1,2}]  }
   0x1   :  { %9 = vsyncpa [#allocation5], 0  ;;  %s867_s9 = smov [#allocation3]   ;;  %s819_s13 = scalar_lea.hbm %s1178_s1, 32768 }
   0x2   :  { %s17_s10 = sshll.u32 %s867_s9, 4  ;;  %p820_p0 = scmp.ne.s32.totalorder %s1178_s1, %s819_s13  ;;  %s18_s10 = int_to_ptr.vmem [resolvable:$true] %s17_s10 }
   0x3   :  { %p823_p1 = scmp.lt.u32.totalorder %s819_s13, %s1178_s1 }
   0x5   :  { %p825_p2 = pnand %p823_p1, %p820_p0 }
   0x7   :  { %828 = shalt.err (!%p825_p2)
}
   0x8   :  { %s829_s18 = scalar_lea.vmem %s18_s10, 32768  ;;  %p834_p4 = scmp.lt.s32.totalorder %s18_s10, %s18_s10 }
   0x9   :  { %p830_p3 = scmp.ne.s32.totalorder %s18_s10, %s829_s18  ;;  %p835_p5 = scmp.lt.s32.totalorder %s829_s18, %s829_s18 }
   0xb   :  { %p836_p6 = por %p835_p5, %p834_p4 }
   0xd   :  { %p837_p7 = pnand %p836_p6, %p830_p3 }
   0xf   :  { %840 = shalt.err (!%p837_p7)
}
  0x10   :  { %s868_s19 = smov 2048   ;;  %s869_s20 = smov 128  }
  0x11   :  { %23 = dma.hbm_to_vmem [thread:$0]  %s1178_s1, 32768, %s18_s10, [#allocation4], %s868_s19, %s868_s19, %s869_s20  }
  0x12   :  { %863 = dma.done.wait [#allocation4], 32768  }
  0x13   :  { %864 = vsyncadd [#allocation4], 4294934528  ;;  %s28_s25 = ssub.f32 0.0, %s1177_s0  ;;  %v29_v1 = vld [vmem:[#allocation3] sm:$0xff]  ;;  %v30_v2 = vld [vmem:[#allocation3 + $0x8] sm:$0xff]  ;;  %s870_s0 = smov [#allocation6]  }
  0x14   :  { %v31_v3 = vld [vmem:[#allocation3 + $0x10] sm:$0xff]  ;;  %v32_v7 = vld [vmem:[#allocation3 + $0x18] sm:$0xff]  ;;  %v33_v8 = vld [vmem:[#allocation3 + $0x20] sm:$0xff]  ;;  %s803_s1 = sshll.u32 %s870_s0, 4  ;;  %s804_s1 = int_to_ptr.vmem [resolvable:$true] %s803_s1 }
  0x15   :  { %v904_v0 = vstv %s28_s25  ;;  %v34_v9 = vld [vmem:[#allocation3 + $0x28] sm:$0xff]  ;;  %v35_v13 = vld [vmem:[#allocation3 + $0x30] sm:$0xff]  ;;  %v36_v14 = vld [vmem:[#allocation3 + $0x38] sm:$0xff]  ;;  %s841_s26 = scalar_lea.vmem %s804_s1, 32768  ;;  %p846_p9 = scmp.lt.s32.totalorder %s804_s1, %s804_s1 }
  0x16   :  { %v286_v4 = vmul.f32 %v904_v0, %v29_v1  ;;  %v287_v5 = vmul.f32 %v904_v0, %v30_v2  ;;  %v288_v6 = vmul.f32 %v904_v0, %v31_v3  ;;  %v289_v10 = vmul.f32 %v904_v0, %v32_v7  ;;  %v37_v15 = vld [vmem:[#allocation3 + $0x40] sm:$0xff]  ;;  %v38_v19 = vld [vmem:[#allocation3 + $0x48] sm:$0xff]  ;;  %v39_v20 = vld [vmem:[#allocation3 + $0x50] sm:$0xff]  ;;  %p842_p8 = scmp.ne.s32.totalorder %s804_s1, %s841_s26  ;;  %p847_p10 = scmp.lt.s32.totalorder %s841_s26, %s841_s26 }
  0x17   :  { %v290_v11 = vmul.f32 %v904_v0, %v33_v8  ;;  %v291_v12 = vmul.f32 %v904_v0, %v34_v9  ;;  %v292_v16 = vmul.f32 %v904_v0, %v35_v13  ;;  %v293_v17 = vmul.f32 %v904_v0, %v36_v14  ;;  %v40_v21 = vld [vmem:[#allocation3 + $0x58] sm:$0xff]  ;;  %v41_v25 = vld [vmem:[#allocation3 + $0x60] sm:$0xff]  ;;  %v42_v26 = vld [vmem:[#allocation3 + $0x68] sm:$0xff] }
  0x18   :  { %542 = vst [vmem:[#allocation6] sm:$0xff] %v286_v4  ;;  %543 = vst [vmem:[#allocation6 + $0x8] sm:$0xff] %v287_v5  ;;  %v294_v18 = vmul.f32 %v904_v0, %v37_v15  ;;  %v295_v22 = vmul.f32 %v904_v0, %v38_v19  ;;  %v296_v23 = vmul.f32 %v904_v0, %v39_v20  ;;  %v43_v27 = vld [vmem:[#allocation3 + $0x70] sm:$0xff]  ;;  %v44_v31 = vld [vmem:[#allocation3 + $0x78] sm:$0xff]  ;;  %p848_p11 = por %p847_p10, %p846_p9 }
  0x19   :  { %544 = vst [vmem:[#allocation6 + $0x10] sm:$0xff] %v288_v6  ;;  %545 = vst [vmem:[#allocation6 + $0x18] sm:$0xff] %v289_v10  ;;  %v297_v24 = vmul.f32 %v904_v0, %v40_v21  ;;  %v298_v28 = vmul.f32 %v904_v0, %v41_v25  ;;  %v299_v29 = vmul.f32 %v904_v0, %v42_v26  ;;  %v45_v32 = vld [vmem:[#allocation3 + $0x80] sm:$0xff]  ;;  %v46_v33 = vld [vmem:[#allocation3 + $0x88] sm:$0xff] }
  0x1a   :  { %546 = vst [vmem:[#allocation6 + $0x20] sm:$0xff] %v290_v11  ;;  %547 = vst [vmem:[#allocation6 + $0x28] sm:$0xff] %v291_v12  ;;  %v300_v30 = vmul.f32 %v904_v0, %v43_v27  ;;  %v301_v34 = vmul.f32 %v904_v0, %v44_v31  ;;  %v302_v35 = vmul.f32 %v904_v0, %v45_v32  ;;  %v47_v37 = vld [vmem:[#allocation3 + $0x90] sm:$0xff]  ;;  %v48_v38 = vld [vmem:[#allocation3 + $0x98] sm:$0xff]  ;;  %p849_p12 = pnand %p848_p11, %p842_p8 }
  0x1b   :  { %548 = vst [vmem:[#allocation6 + $0x30] sm:$0xff] %v292_v16  ;;  %549 = vst [vmem:[#allocation6 + $0x38] sm:$0xff] %v293_v17  ;;  %v303_v36 = vmul.f32 %v904_v0, %v46_v33  ;;  %v49_v39 = vld [vmem:[#allocation3 + $0xa0] sm:$0xff]  ;;  %v304_v40 = vmul.f32 %v904_v0, %v47_v37  ;;  %v305_v41 = vmul.f32 %v904_v0, %v48_v38  ;;  %v50_v43 = vld [vmem:[#allocation3 + $0xa8] sm:$0xff] }
  0x1c   :  { %550 = vst [vmem:[#allocation6 + $0x40] sm:$0xff] %v294_v18  ;;  %551 = vst [vmem:[#allocation6 + $0x48] sm:$0xff] %v295_v22  ;;  %v306_v42 = vmul.f32 %v904_v0, %v49_v39  ;;  %v51_v44 = vld [vmem:[#allocation3 + $0xb0] sm:$0xff]  ;;  %v52_v45 = vld [vmem:[#allocation3 + $0xb8] sm:$0xff]  ;;  %v307_v46 = vmul.f32 %v904_v0, %v50_v43 }
  0x1d   :  { %552 = vst [vmem:[#allocation6 + $0x50] sm:$0xff] %v296_v23  ;;  %553 = vst [vmem:[#allocation6 + $0x58] sm:$0xff] %v297_v24  ;;  %v308_v47 = vmul.f32 %v904_v0, %v51_v44  ;;  %v309_v48 = vmul.f32 %v904_v0, %v52_v45  ;;  %v53_v49 = vld [vmem:[#allocation3 + $0xc0] sm:$0xff]  ;;  %v54_v50 = vld [vmem:[#allocation3 + $0xc8] sm:$0xff] }
  0x1e   :  { %554 = vst [vmem:[#allocation6 + $0x60] sm:$0xff] %v298_v28  ;;  %555 = vst [vmem:[#allocation6 + $0x68] sm:$0xff] %v299_v29  ;;  %v55_v51 = vld [vmem:[#allocation3 + $0xd0] sm:$0xff]  ;;  %v310_v52 = vmul.f32 %v904_v0, %v53_v49  ;;  %v311_v53 = vmul.f32 %v904_v0, %v54_v50  ;;  %v56_v55 = vld [vmem:[#allocation3 + $0xd8] sm:$0xff] }
  0x1f   :  { %556 = vst [vmem:[#allocation6 + $0x70] sm:$0xff] %v300_v30  ;;  %557 = vst [vmem:[#allocation6 + $0x78] sm:$0xff] %v301_v34  ;;  %v312_v54 = vmul.f32 %v904_v0, %v55_v51  ;;  %v57_v56 = vld [vmem:[#allocation3 + $0xe0] sm:$0xff]  ;;  %v58_v57 = vld [vmem:[#allocation3 + $0xe8] sm:$0xff]  ;;  %v313_v58 = vmul.f32 %v904_v0, %v56_v55 }
  0x20   :  { %558 = vst [vmem:[#allocation6 + $0x80] sm:$0xff] %v302_v35  ;;  %559 = vst [vmem:[#allocation6 + $0x88] sm:$0xff] %v303_v36  ;;  %v314_v59 = vmul.f32 %v904_v0, %v57_v56  ;;  %v315_v60 = vmul.f32 %v904_v0, %v58_v57  ;;  %v59_v61 = vld [vmem:[#allocation3 + $0xf0] sm:$0xff]  ;;  %v60_v62 = vld [vmem:[#allocation3 + $0xf8] sm:$0xff] }
  0x21   :  { %560 = vst [vmem:[#allocation6 + $0x90] sm:$0xff] %v304_v40  ;;  %561 = vst [vmem:[#allocation6 + $0x98] sm:$0xff] %v305_v41  ;;  %v61_v63 = vld [vmem:[#allocation3 + $0x100] sm:$0xff]  ;;  %v316_v1 = vmul.f32 %v904_v0, %v59_v61  ;;  %v317_v2 = vmul.f32 %v904_v0, %v60_v62  ;;  %v62_v4 = vld [vmem:[#allocation3 + $0x108] sm:$0xff] }
  0x22   :  { %562 = vst [vmem:[#allocation6 + $0xa0] sm:$0xff] %v306_v42  ;;  %563 = vst [vmem:[#allocation6 + $0xa8] sm:$0xff] %v307_v46  ;;  %v318_v3 = vmul.f32 %v904_v0, %v61_v63  ;;  %v63_v5 = vld [vmem:[#allocation3 + $0x110] sm:$0xff]  ;;  %v64_v6 = vld [vmem:[#allocation3 + $0x118] sm:$0xff]  ;;  %v319_v7 = vmul.f32 %v904_v0, %v62_v4 }
  0x23   :  { %564 = vst [vmem:[#allocation6 + $0xb0] sm:$0xff] %v308_v47  ;;  %565 = vst [vmem:[#allocation6 + $0xb8] sm:$0xff] %v309_v48  ;;  %v320_v8 = vmul.f32 %v904_v0, %v63_v5  ;;  %v321_v9 = vmul.f32 %v904_v0, %v64_v6  ;;  %v65_v10 = vld [vmem:[#allocation3 + $0x120] sm:$0xff]  ;;  %v66_v11 = vld [vmem:[#allocation3 + $0x128] sm:$0xff] }
  0x24   :  { %566 = vst [vmem:[#allocation6 + $0xc0] sm:$0xff] %v310_v52  ;;  %567 = vst [vmem:[#allocation6 + $0xc8] sm:$0xff] %v311_v53  ;;  %v67_v12 = vld [vmem:[#allocation3 + $0x130] sm:$0xff]  ;;  %v322_v13 = vmul.f32 %v904_v0, %v65_v10  ;;  %v323_v14 = vmul.f32 %v904_v0, %v66_v11  ;;  %v68_v16 = vld [vmem:[#allocation3 + $0x138] sm:$0xff] }
  0x25   :  { %568 = vst [vmem:[#allocation6 + $0xd0] sm:$0xff] %v312_v54  ;;  %569 = vst [vmem:[#allocation6 + $0xd8] sm:$0xff] %v313_v58  ;;  %v324_v15 = vmul.f32 %v904_v0, %v67_v12  ;;  %v69_v17 = vld [vmem:[#allocation3 + $0x140] sm:$0xff]  ;;  %v70_v18 = vld [vmem:[#allocation3 + $0x148] sm:$0xff]  ;;  %v325_v19 = vmul.f32 %v904_v0, %v68_v16 }
  0x26   :  { %570 = vst [vmem:[#allocation6 + $0xe0] sm:$0xff] %v314_v59  ;;  %571 = vst [vmem:[#allocation6 + $0xe8] sm:$0xff] %v315_v60  ;;  %v326_v20 = vmul.f32 %v904_v0, %v69_v17  ;;  %v327_v21 = vmul.f32 %v904_v0, %v70_v18  ;;  %v71_v22 = vld [vmem:[#allocation3 + $0x150] sm:$0xff]  ;;  %v72_v23 = vld [vmem:[#allocation3 + $0x158] sm:$0xff] }
  0x27   :  { %572 = vst [vmem:[#allocation6 + $0xf0] sm:$0xff] %v316_v1  ;;  %573 = vst [vmem:[#allocation6 + $0xf8] sm:$0xff] %v317_v2  ;;  %v73_v24 = vld [vmem:[#allocation3 + $0x160] sm:$0xff]  ;;  %v328_v25 = vmul.f32 %v904_v0, %v71_v22  ;;  %v329_v26 = vmul.f32 %v904_v0, %v72_v23  ;;  %v74_v28 = vld [vmem:[#allocation3 + $0x168] sm:$0xff] }
  0x28   :  { %574 = vst [vmem:[#allocation6 + $0x100] sm:$0xff] %v318_v3  ;;  %575 = vst [vmem:[#allocation6 + $0x108] sm:$0xff] %v319_v7  ;;  %v330_v27 = vmul.f32 %v904_v0, %v73_v24  ;;  %v75_v29 = vld [vmem:[#allocation3 + $0x170] sm:$0xff]  ;;  %v76_v30 = vld [vmem:[#allocation3 + $0x178] sm:$0xff]  ;;  %v331_v31 = vmul.f32 %v904_v0, %v74_v28 }
  0x29   :  { %576 = vst [vmem:[#allocation6 + $0x110] sm:$0xff] %v320_v8  ;;  %577 = vst [vmem:[#allocation6 + $0x118] sm:$0xff] %v321_v9  ;;  %v332_v32 = vmul.f32 %v904_v0, %v75_v29  ;;  %v333_v33 = vmul.f32 %v904_v0, %v76_v30  ;;  %v77_v34 = vld [vmem:[#allocation3 + $0x180] sm:$0xff]  ;;  %v78_v35 = vld [vmem:[#allocation3 + $0x188] sm:$0xff] }
  0x2a   :  { %578 = vst [vmem:[#allocation6 + $0x120] sm:$0xff] %v322_v13  ;;  %579 = vst [vmem:[#allocation6 + $0x128] sm:$0xff] %v323_v14  ;;  %v79_v36 = vld [vmem:[#allocation3 + $0x190] sm:$0xff]  ;;  %v334_v37 = vmul.f32 %v904_v0, %v77_v34  ;;  %v335_v38 = vmul.f32 %v904_v0, %v78_v35  ;;  %v80_v40 = vld [vmem:[#allocation3 + $0x198] sm:$0xff] }
  0x2b   :  { %580 = vst [vmem:[#allocation6 + $0x130] sm:$0xff] %v324_v15  ;;  %581 = vst [vmem:[#allocation6 + $0x138] sm:$0xff] %v325_v19  ;;  %v336_v39 = vmul.f32 %v904_v0, %v79_v36  ;;  %v81_v41 = vld [vmem:[#allocation3 + $0x1a0] sm:$0xff]  ;;  %v82_v42 = vld [vmem:[#allocation3 + $0x1a8] sm:$0xff]  ;;  %v337_v43 = vmul.f32 %v904_v0, %v80_v40 }
  0x2c   :  { %582 = vst [vmem:[#allocation6 + $0x140] sm:$0xff] %v326_v20  ;;  %583 = vst [vmem:[#allocation6 + $0x148] sm:$0xff] %v327_v21  ;;  %v338_v44 = vmul.f32 %v904_v0, %v81_v41  ;;  %v339_v45 = vmul.f32 %v904_v0, %v82_v42  ;;  %v83_v46 = vld [vmem:[#allocation3 + $0x1b0] sm:$0xff]  ;;  %v84_v47 = vld [vmem:[#allocation3 + $0x1b8] sm:$0xff] }
  0x2d   :  { %584 = vst [vmem:[#allocation6 + $0x150] sm:$0xff] %v328_v25  ;;  %585 = vst [vmem:[#allocation6 + $0x158] sm:$0xff] %v329_v26  ;;  %v85_v48 = vld [vmem:[#allocation3 + $0x1c0] sm:$0xff]  ;;  %v340_v49 = vmul.f32 %v904_v0, %v83_v46  ;;  %v341_v50 = vmul.f32 %v904_v0, %v84_v47  ;;  %v86_v52 = vld [vmem:[#allocation3 + $0x1c8] sm:$0xff] }
  0x2e   :  { %586 = vst [vmem:[#allocation6 + $0x160] sm:$0xff] %v330_v27  ;;  %587 = vst [vmem:[#allocation6 + $0x168] sm:$0xff] %v331_v31  ;;  %v342_v51 = vmul.f32 %v904_v0, %v85_v48  ;;  %v87_v53 = vld [vmem:[#allocation3 + $0x1d0] sm:$0xff]  ;;  %v88_v54 = vld [vmem:[#allocation3 + $0x1d8] sm:$0xff]  ;;  %v343_v55 = vmul.f32 %v904_v0, %v86_v52 }
  0x2f   :  { %588 = vst [vmem:[#allocation6 + $0x170] sm:$0xff] %v332_v32  ;;  %589 = vst [vmem:[#allocation6 + $0x178] sm:$0xff] %v333_v33  ;;  %v344_v56 = vmul.f32 %v904_v0, %v87_v53  ;;  %v345_v57 = vmul.f32 %v904_v0, %v88_v54  ;;  %v89_v58 = vld [vmem:[#allocation3 + $0x1e0] sm:$0xff]  ;;  %v90_v59 = vld [vmem:[#allocation3 + $0x1e8] sm:$0xff] }
  0x30   :  { %590 = vst [vmem:[#allocation6 + $0x180] sm:$0xff] %v334_v37  ;;  %591 = vst [vmem:[#allocation6 + $0x188] sm:$0xff] %v335_v38  ;;  %v91_v60 = vld [vmem:[#allocation3 + $0x1f0] sm:$0xff]  ;;  %v346_v61 = vmul.f32 %v904_v0, %v89_v58  ;;  %v347_v62 = vmul.f32 %v904_v0, %v90_v59  ;;  %v92_v1 = vld [vmem:[#allocation3 + $0x1f8] sm:$0xff] }
  0x31   :  { %592 = vst [vmem:[#allocation6 + $0x190] sm:$0xff] %v336_v39  ;;  %593 = vst [vmem:[#allocation6 + $0x198] sm:$0xff] %v337_v43  ;;  %v348_v63 = vmul.f32 %v904_v0, %v91_v60  ;;  %v93_v2 = vld [vmem:[#allocation3 + $0x200] sm:$0xff]  ;;  %v94_v3 = vld [vmem:[#allocation3 + $0x208] sm:$0xff]  ;;  %v349_v4 = vmul.f32 %v904_v0, %v92_v1 }
  0x32   :  { %594 = vst [vmem:[#allocation6 + $0x1a0] sm:$0xff] %v338_v44  ;;  %595 = vst [vmem:[#allocation6 + $0x1a8] sm:$0xff] %v339_v45  ;;  %v350_v5 = vmul.f32 %v904_v0, %v93_v2  ;;  %v351_v6 = vmul.f32 %v904_v0, %v94_v3  ;;  %v95_v7 = vld [vmem:[#allocation3 + $0x210] sm:$0xff]  ;;  %v96_v8 = vld [vmem:[#allocation3 + $0x218] sm:$0xff] }
  0x33   :  { %596 = vst [vmem:[#allocation6 + $0x1b0] sm:$0xff] %v340_v49  ;;  %597 = vst [vmem:[#allocation6 + $0x1b8] sm:$0xff] %v341_v50  ;;  %v97_v9 = vld [vmem:[#allocation3 + $0x220] sm:$0xff]  ;;  %v352_v10 = vmul.f32 %v904_v0, %v95_v7  ;;  %v353_v11 = vmul.f32 %v904_v0, %v96_v8  ;;  %v98_v13 = vld [vmem:[#allocation3 + $0x228] sm:$0xff] }
  0x34   :  { %598 = vst [vmem:[#allocation6 + $0x1c0] sm:$0xff] %v342_v51  ;;  %599 = vst [vmem:[#allocation6 + $0x1c8] sm:$0xff] %v343_v55  ;;  %v354_v12 = vmul.f32 %v904_v0, %v97_v9  ;;  %v99_v14 = vld [vmem:[#allocation3 + $0x230] sm:$0xff]  ;;  %v100_v15 = vld [vmem:[#allocation3 + $0x238] sm:$0xff]  ;;  %v355_v16 = vmul.f32 %v904_v0, %v98_v13 }
  0x35   :  { %600 = vst [vmem:[#allocation6 + $0x1d0] sm:$0xff] %v344_v56  ;;  %601 = vst [vmem:[#allocation6 + $0x1d8] sm:$0xff] %v345_v57  ;;  %v356_v17 = vmul.f32 %v904_v0, %v99_v14  ;;  %v357_v18 = vmul.f32 %v904_v0, %v100_v15  ;;  %v101_v19 = vld [vmem:[#allocation3 + $0x240] sm:$0xff]  ;;  %v102_v20 = vld [vmem:[#allocation3 + $0x248] sm:$0xff] }
  0x36   :  { %602 = vst [vmem:[#allocation6 + $0x1e0] sm:$0xff] %v346_v61  ;;  %603 = vst [vmem:[#allocation6 + $0x1e8] sm:$0xff] %v347_v62  ;;  %v103_v21 = vld [vmem:[#allocation3 + $0x250] sm:$0xff]  ;;  %v358_v22 = vmul.f32 %v904_v0, %v101_v19  ;;  %v359_v23 = vmul.f32 %v904_v0, %v102_v20  ;;  %v104_v25 = vld [vmem:[#allocation3 + $0x258] sm:$0xff] }
  0x37   :  { %604 = vst [vmem:[#allocation6 + $0x1f0] sm:$0xff] %v348_v63  ;;  %605 = vst [vmem:[#allocation6 + $0x1f8] sm:$0xff] %v349_v4  ;;  %v360_v24 = vmul.f32 %v904_v0, %v103_v21  ;;  %v105_v26 = vld [vmem:[#allocation3 + $0x260] sm:$0xff]  ;;  %v106_v27 = vld [vmem:[#allocation3 + $0x268] sm:$0xff]  ;;  %v361_v28 = vmul.f32 %v904_v0, %v104_v25 }
  0x38   :  { %606 = vst [vmem:[#allocation6 + $0x200] sm:$0xff] %v350_v5  ;;  %607 = vst [vmem:[#allocation6 + $0x208] sm:$0xff] %v351_v6  ;;  %v362_v29 = vmul.f32 %v904_v0, %v105_v26  ;;  %v363_v30 = vmul.f32 %v904_v0, %v106_v27  ;;  %v107_v31 = vld [vmem:[#allocation3 + $0x270] sm:$0xff]  ;;  %v108_v32 = vld [vmem:[#allocation3 + $0x278] sm:$0xff] }
  0x39   :  { %608 = vst [vmem:[#allocation6 + $0x210] sm:$0xff] %v352_v10  ;;  %609 = vst [vmem:[#allocation6 + $0x218] sm:$0xff] %v353_v11  ;;  %v109_v33 = vld [vmem:[#allocation3 + $0x280] sm:$0xff]  ;;  %v364_v34 = vmul.f32 %v904_v0, %v107_v31  ;;  %v365_v35 = vmul.f32 %v904_v0, %v108_v32  ;;  %v110_v37 = vld [vmem:[#allocation3 + $0x288] sm:$0xff] }
  0x3a   :  { %610 = vst [vmem:[#allocation6 + $0x220] sm:$0xff] %v354_v12  ;;  %611 = vst [vmem:[#allocation6 + $0x228] sm:$0xff] %v355_v16  ;;  %v366_v36 = vmul.f32 %v904_v0, %v109_v33  ;;  %v111_v38 = vld [vmem:[#allocation3 + $0x290] sm:$0xff]  ;;  %v112_v39 = vld [vmem:[#allocation3 + $0x298] sm:$0xff]  ;;  %v367_v40 = vmul.f32 %v904_v0, %v110_v37 }
  0x3b   :  { %612 = vst [vmem:[#allocation6 + $0x230] sm:$0xff] %v356_v17  ;;  %613 = vst [vmem:[#allocation6 + $0x238] sm:$0xff] %v357_v18  ;;  %v368_v41 = vmul.f32 %v904_v0, %v111_v38  ;;  %v369_v42 = vmul.f32 %v904_v0, %v112_v39  ;;  %v113_v43 = vld [vmem:[#allocation3 + $0x2a0] sm:$0xff]  ;;  %v114_v44 = vld [vmem:[#allocation3 + $0x2a8] sm:$0xff] }
  0x3c   :  { %614 = vst [vmem:[#allocation6 + $0x240] sm:$0xff] %v358_v22  ;;  %615 = vst [vmem:[#allocation6 + $0x248] sm:$0xff] %v359_v23  ;;  %v115_v45 = vld [vmem:[#allocation3 + $0x2b0] sm:$0xff]  ;;  %v370_v46 = vmul.f32 %v904_v0, %v113_v43  ;;  %v371_v47 = vmul.f32 %v904_v0, %v114_v44  ;;  %v116_v49 = vld [vmem:[#allocation3 + $0x2b8] sm:$0xff] }
  0x3d   :  { %616 = vst [vmem:[#allocation6 + $0x250] sm:$0xff] %v360_v24  ;;  %617 = vst [vmem:[#allocation6 + $0x258] sm:$0xff] %v361_v28  ;;  %v372_v48 = vmul.f32 %v904_v0, %v115_v45  ;;  %v117_v50 = vld [vmem:[#allocation3 + $0x2c0] sm:$0xff]  ;;  %v118_v51 = vld [vmem:[#allocation3 + $0x2c8] sm:$0xff]  ;;  %v373_v52 = vmul.f32 %v904_v0, %v116_v49 }
  0x3e   :  { %618 = vst [vmem:[#allocation6 + $0x260] sm:$0xff] %v362_v29  ;;  %619 = vst [vmem:[#allocation6 + $0x268] sm:$0xff] %v363_v30  ;;  %v374_v53 = vmul.f32 %v904_v0, %v117_v50  ;;  %v375_v54 = vmul.f32 %v904_v0, %v118_v51  ;;  %v119_v55 = vld [vmem:[#allocation3 + $0x2d0] sm:$0xff]  ;;  %v120_v56 = vld [vmem:[#allocation3 + $0x2d8] sm:$0xff] }
  0x3f   :  { %620 = vst [vmem:[#allocation6 + $0x270] sm:$0xff] %v364_v34  ;;  %621 = vst [vmem:[#allocation6 + $0x278] sm:$0xff] %v365_v35  ;;  %v121_v57 = vld [vmem:[#allocation3 + $0x2e0] sm:$0xff]  ;;  %v376_v58 = vmul.f32 %v904_v0, %v119_v55  ;;  %v377_v59 = vmul.f32 %v904_v0, %v120_v56  ;;  %v122_v61 = vld [vmem:[#allocation3 + $0x2e8] sm:$0xff] }
  0x40   :  { %622 = vst [vmem:[#allocation6 + $0x280] sm:$0xff] %v366_v36  ;;  %623 = vst [vmem:[#allocation6 + $0x288] sm:$0xff] %v367_v40  ;;  %v378_v60 = vmul.f32 %v904_v0, %v121_v57  ;;  %v123_v62 = vld [vmem:[#allocation3 + $0x2f0] sm:$0xff]  ;;  %v124_v63 = vld [vmem:[#allocation3 + $0x2f8] sm:$0xff]  ;;  %v379_v1 = vmul.f32 %v904_v0, %v122_v61 }
  0x41   :  { %624 = vst [vmem:[#allocation6 + $0x290] sm:$0xff] %v368_v41  ;;  %625 = vst [vmem:[#allocation6 + $0x298] sm:$0xff] %v369_v42  ;;  %v380_v2 = vmul.f32 %v904_v0, %v123_v62  ;;  %v381_v3 = vmul.f32 %v904_v0, %v124_v63  ;;  %v125_v4 = vld [vmem:[#allocation3 + $0x300] sm:$0xff]  ;;  %v126_v5 = vld [vmem:[#allocation3 + $0x308] sm:$0xff] }
  0x42   :  { %626 = vst [vmem:[#allocation6 + $0x2a0] sm:$0xff] %v370_v46  ;;  %627 = vst [vmem:[#allocation6 + $0x2a8] sm:$0xff] %v371_v47  ;;  %v127_v6 = vld [vmem:[#allocation3 + $0x310] sm:$0xff]  ;;  %v382_v7 = vmul.f32 %v904_v0, %v125_v4  ;;  %v383_v8 = vmul.f32 %v904_v0, %v126_v5  ;;  %v128_v10 = vld [vmem:[#allocation3 + $0x318] sm:$0xff] }
  0x43   :  { %628 = vst [vmem:[#allocation6 + $0x2b0] sm:$0xff] %v372_v48  ;;  %629 = vst [vmem:[#allocation6 + $0x2b8] sm:$0xff] %v373_v52  ;;  %v384_v9 = vmul.f32 %v904_v0, %v127_v6  ;;  %v129_v11 = vld [vmem:[#allocation3 + $0x320] sm:$0xff]  ;;  %v130_v12 = vld [vmem:[#allocation3 + $0x328] sm:$0xff]  ;;  %v385_v13 = vmul.f32 %v904_v0, %v128_v10 }
  0x44   :  { %630 = vst [vmem:[#allocation6 + $0x2c0] sm:$0xff] %v374_v53  ;;  %631 = vst [vmem:[#allocation6 + $0x2c8] sm:$0xff] %v375_v54  ;;  %v386_v14 = vmul.f32 %v904_v0, %v129_v11  ;;  %v387_v15 = vmul.f32 %v904_v0, %v130_v12  ;;  %v131_v16 = vld [vmem:[#allocation3 + $0x330] sm:$0xff]  ;;  %v132_v17 = vld [vmem:[#allocation3 + $0x338] sm:$0xff] }
  0x45   :  { %632 = vst [vmem:[#allocation6 + $0x2d0] sm:$0xff] %v376_v58  ;;  %633 = vst [vmem:[#allocation6 + $0x2d8] sm:$0xff] %v377_v59  ;;  %v133_v18 = vld [vmem:[#allocation3 + $0x340] sm:$0xff]  ;;  %v388_v19 = vmul.f32 %v904_v0, %v131_v16  ;;  %v389_v20 = vmul.f32 %v904_v0, %v132_v17  ;;  %v134_v22 = vld [vmem:[#allocation3 + $0x348] sm:$0xff] }
  0x46   :  { %634 = vst [vmem:[#allocation6 + $0x2e0] sm:$0xff] %v378_v60  ;;  %635 = vst [vmem:[#allocation6 + $0x2e8] sm:$0xff] %v379_v1  ;;  %v390_v21 = vmul.f32 %v904_v0, %v133_v18  ;;  %v135_v23 = vld [vmem:[#allocation3 + $0x350] sm:$0xff]  ;;  %v136_v24 = vld [vmem:[#allocation3 + $0x358] sm:$0xff]  ;;  %v391_v25 = vmul.f32 %v904_v0, %v134_v22 }
  0x47   :  { %636 = vst [vmem:[#allocation6 + $0x2f0] sm:$0xff] %v380_v2  ;;  %637 = vst [vmem:[#allocation6 + $0x2f8] sm:$0xff] %v381_v3  ;;  %v392_v26 = vmul.f32 %v904_v0, %v135_v23  ;;  %v393_v27 = vmul.f32 %v904_v0, %v136_v24  ;;  %v137_v28 = vld [vmem:[#allocation3 + $0x360] sm:$0xff]  ;;  %v138_v29 = vld [vmem:[#allocation3 + $0x368] sm:$0xff] }
  0x48   :  { %638 = vst [vmem:[#allocation6 + $0x300] sm:$0xff] %v382_v7  ;;  %639 = vst [vmem:[#allocation6 + $0x308] sm:$0xff] %v383_v8  ;;  %v139_v30 = vld [vmem:[#allocation3 + $0x370] sm:$0xff]  ;;  %v394_v31 = vmul.f32 %v904_v0, %v137_v28  ;;  %v395_v32 = vmul.f32 %v904_v0, %v138_v29  ;;  %v140_v34 = vld [vmem:[#allocation3 + $0x378] sm:$0xff] }
  0x49   :  { %640 = vst [vmem:[#allocation6 + $0x310] sm:$0xff] %v384_v9  ;;  %641 = vst [vmem:[#allocation6 + $0x318] sm:$0xff] %v385_v13  ;;  %v396_v33 = vmul.f32 %v904_v0, %v139_v30  ;;  %v141_v35 = vld [vmem:[#allocation3 + $0x380] sm:$0xff]  ;;  %v142_v36 = vld [vmem:[#allocation3 + $0x388] sm:$0xff]  ;;  %v397_v37 = vmul.f32 %v904_v0, %v140_v34 }
  0x4a   :  { %642 = vst [vmem:[#allocation6 + $0x320] sm:$0xff] %v386_v14  ;;  %643 = vst [vmem:[#allocation6 + $0x328] sm:$0xff] %v387_v15  ;;  %v398_v38 = vmul.f32 %v904_v0, %v141_v35  ;;  %v399_v39 = vmul.f32 %v904_v0, %v142_v36  ;;  %v143_v40 = vld [vmem:[#allocation3 + $0x390] sm:$0xff]  ;;  %v144_v41 = vld [vmem:[#allocation3 + $0x398] sm:$0xff] }
  0x4b   :  { %644 = vst [vmem:[#allocation6 + $0x330] sm:$0xff] %v388_v19  ;;  %645 = vst [vmem:[#allocation6 + $0x338] sm:$0xff] %v389_v20  ;;  %v145_v42 = vld [vmem:[#allocation3 + $0x3a0] sm:$0xff]  ;;  %v400_v43 = vmul.f32 %v904_v0, %v143_v40  ;;  %v401_v44 = vmul.f32 %v904_v0, %v144_v41  ;;  %v146_v46 = vld [vmem:[#allocation3 + $0x3a8] sm:$0xff] }
  0x4c   :  { %646 = vst [vmem:[#allocation6 + $0x340] sm:$0xff] %v390_v21  ;;  %647 = vst [vmem:[#allocation6 + $0x348] sm:$0xff] %v391_v25  ;;  %v402_v45 = vmul.f32 %v904_v0, %v145_v42  ;;  %v147_v47 = vld [vmem:[#allocation3 + $0x3b0] sm:$0xff]  ;;  %v148_v48 = vld [vmem:[#allocation3 + $0x3b8] sm:$0xff]  ;;  %v403_v49 = vmul.f32 %v904_v0, %v146_v46 }
  0x4d   :  { %648 = vst [vmem:[#allocation6 + $0x350] sm:$0xff] %v392_v26  ;;  %649 = vst [vmem:[#allocation6 + $0x358] sm:$0xff] %v393_v27  ;;  %v404_v50 = vmul.f32 %v904_v0, %v147_v47  ;;  %v405_v51 = vmul.f32 %v904_v0, %v148_v48  ;;  %v149_v52 = vld [vmem:[#allocation3 + $0x3c0] sm:$0xff]  ;;  %v150_v53 = vld [vmem:[#allocation3 + $0x3c8] sm:$0xff] }
  0x4e   :  { %650 = vst [vmem:[#allocation6 + $0x360] sm:$0xff] %v394_v31  ;;  %651 = vst [vmem:[#allocation6 + $0x368] sm:$0xff] %v395_v32  ;;  %v151_v54 = vld [vmem:[#allocation3 + $0x3d0] sm:$0xff]  ;;  %v406_v55 = vmul.f32 %v904_v0, %v149_v52  ;;  %v407_v56 = vmul.f32 %v904_v0, %v150_v53  ;;  %v152_v58 = vld [vmem:[#allocation3 + $0x3d8] sm:$0xff] }
  0x4f   :  { %652 = vst [vmem:[#allocation6 + $0x370] sm:$0xff] %v396_v33  ;;  %653 = vst [vmem:[#allocation6 + $0x378] sm:$0xff] %v397_v37  ;;  %v408_v57 = vmul.f32 %v904_v0, %v151_v54  ;;  %v153_v59 = vld [vmem:[#allocation3 + $0x3e0] sm:$0xff]  ;;  %v154_v60 = vld [vmem:[#allocation3 + $0x3e8] sm:$0xff]  ;;  %v409_v61 = vmul.f32 %v904_v0, %v152_v58 }
  0x50   :  { %654 = vst [vmem:[#allocation6 + $0x380] sm:$0xff] %v398_v38  ;;  %655 = vst [vmem:[#allocation6 + $0x388] sm:$0xff] %v399_v39  ;;  %v410_v62 = vmul.f32 %v904_v0, %v153_v59  ;;  %v411_v63 = vmul.f32 %v904_v0, %v154_v60  ;;  %v155_v1 = vld [vmem:[#allocation3 + $0x3f0] sm:$0xff]  ;;  %v156_v2 = vld [vmem:[#allocation3 + $0x3f8] sm:$0xff] }
  0x51   :  { %656 = vst [vmem:[#allocation6 + $0x390] sm:$0xff] %v400_v43  ;;  %657 = vst [vmem:[#allocation6 + $0x398] sm:$0xff] %v401_v44  ;;  %v157_v3 = vld [vmem:[#allocation3 + $0x400] sm:$0xff]  ;;  %v412_v4 = vmul.f32 %v904_v0, %v155_v1  ;;  %v413_v5 = vmul.f32 %v904_v0, %v156_v2  ;;  %v158_v7 = vld [vmem:[#allocation3 + $0x408] sm:$0xff] }
  0x52   :  { %658 = vst [vmem:[#allocation6 + $0x3a0] sm:$0xff] %v402_v45  ;;  %659 = vst [vmem:[#allocation6 + $0x3a8] sm:$0xff] %v403_v49  ;;  %v414_v6 = vmul.f32 %v904_v0, %v157_v3  ;;  %v159_v8 = vld [vmem:[#allocation3 + $0x410] sm:$0xff]  ;;  %v160_v9 = vld [vmem:[#allocation3 + $0x418] sm:$0xff]  ;;  %v415_v10 = vmul.f32 %v904_v0, %v158_v7 }
  0x53   :  { %660 = vst [vmem:[#allocation6 + $0x3b0] sm:$0xff] %v404_v50  ;;  %661 = vst [vmem:[#allocation6 + $0x3b8] sm:$0xff] %v405_v51  ;;  %v416_v11 = vmul.f32 %v904_v0, %v159_v8  ;;  %v417_v12 = vmul.f32 %v904_v0, %v160_v9  ;;  %v161_v13 = vld [vmem:[#allocation3 + $0x420] sm:$0xff]  ;;  %v162_v14 = vld [vmem:[#allocation3 + $0x428] sm:$0xff] }
  0x54   :  { %662 = vst [vmem:[#allocation6 + $0x3c0] sm:$0xff] %v406_v55  ;;  %663 = vst [vmem:[#allocation6 + $0x3c8] sm:$0xff] %v407_v56  ;;  %v163_v15 = vld [vmem:[#allocation3 + $0x430] sm:$0xff]  ;;  %v418_v16 = vmul.f32 %v904_v0, %v161_v13  ;;  %v419_v17 = vmul.f32 %v904_v0, %v162_v14  ;;  %v164_v19 = vld [vmem:[#allocation3 + $0x438] sm:$0xff] }
  0x55   :  { %664 = vst [vmem:[#allocation6 + $0x3d0] sm:$0xff] %v408_v57  ;;  %665 = vst [vmem:[#allocation6 + $0x3d8] sm:$0xff] %v409_v61  ;;  %v420_v18 = vmul.f32 %v904_v0, %v163_v15  ;;  %v165_v20 = vld [vmem:[#allocation3 + $0x440] sm:$0xff]  ;;  %v166_v21 = vld [vmem:[#allocation3 + $0x448] sm:$0xff]  ;;  %v421_v22 = vmul.f32 %v904_v0, %v164_v19 }
  0x56   :  { %666 = vst [vmem:[#allocation6 + $0x3e0] sm:$0xff] %v410_v62  ;;  %667 = vst [vmem:[#allocation6 + $0x3e8] sm:$0xff] %v411_v63  ;;  %v422_v23 = vmul.f32 %v904_v0, %v165_v20  ;;  %v423_v24 = vmul.f32 %v904_v0, %v166_v21  ;;  %v167_v25 = vld [vmem:[#allocation3 + $0x450] sm:$0xff]  ;;  %v168_v26 = vld [vmem:[#allocation3 + $0x458] sm:$0xff] }
  0x57   :  { %668 = vst [vmem:[#allocation6 + $0x3f0] sm:$0xff] %v412_v4  ;;  %669 = vst [vmem:[#allocation6 + $0x3f8] sm:$0xff] %v413_v5  ;;  %v169_v27 = vld [vmem:[#allocation3 + $0x460] sm:$0xff]  ;;  %v424_v28 = vmul.f32 %v904_v0, %v167_v25  ;;  %v425_v29 = vmul.f32 %v904_v0, %v168_v26  ;;  %v170_v31 = vld [vmem:[#allocation3 + $0x468] sm:$0xff] }
  0x58   :  { %670 = vst [vmem:[#allocation6 + $0x400] sm:$0xff] %v414_v6  ;;  %671 = vst [vmem:[#allocation6 + $0x408] sm:$0xff] %v415_v10  ;;  %v426_v30 = vmul.f32 %v904_v0, %v169_v27  ;;  %v171_v32 = vld [vmem:[#allocation3 + $0x470] sm:$0xff]  ;;  %v172_v33 = vld [vmem:[#allocation3 + $0x478] sm:$0xff]  ;;  %v427_v34 = vmul.f32 %v904_v0, %v170_v31 }
  0x59   :  { %672 = vst [vmem:[#allocation6 + $0x410] sm:$0xff] %v416_v11  ;;  %673 = vst [vmem:[#allocation6 + $0x418] sm:$0xff] %v417_v12  ;;  %v428_v35 = vmul.f32 %v904_v0, %v171_v32  ;;  %v429_v36 = vmul.f32 %v904_v0, %v172_v33  ;;  %v173_v37 = vld [vmem:[#allocation3 + $0x480] sm:$0xff]  ;;  %v174_v38 = vld [vmem:[#allocation3 + $0x488] sm:$0xff] }
  0x5a   :  { %674 = vst [vmem:[#allocation6 + $0x420] sm:$0xff] %v418_v16  ;;  %675 = vst [vmem:[#allocation6 + $0x428] sm:$0xff] %v419_v17  ;;  %v175_v39 = vld [vmem:[#allocation3 + $0x490] sm:$0xff]  ;;  %v430_v40 = vmul.f32 %v904_v0, %v173_v37  ;;  %v431_v41 = vmul.f32 %v904_v0, %v174_v38  ;;  %v176_v43 = vld [vmem:[#allocation3 + $0x498] sm:$0xff] }
  0x5b   :  { %676 = vst [vmem:[#allocation6 + $0x430] sm:$0xff] %v420_v18  ;;  %677 = vst [vmem:[#allocation6 + $0x438] sm:$0xff] %v421_v22  ;;  %v432_v42 = vmul.f32 %v904_v0, %v175_v39  ;;  %v177_v44 = vld [vmem:[#allocation3 + $0x4a0] sm:$0xff]  ;;  %v178_v45 = vld [vmem:[#allocation3 + $0x4a8] sm:$0xff]  ;;  %v433_v46 = vmul.f32 %v904_v0, %v176_v43 }
  0x5c   :  { %678 = vst [vmem:[#allocation6 + $0x440] sm:$0xff] %v422_v23  ;;  %679 = vst [vmem:[#allocation6 + $0x448] sm:$0xff] %v423_v24  ;;  %v434_v47 = vmul.f32 %v904_v0, %v177_v44  ;;  %v435_v48 = vmul.f32 %v904_v0, %v178_v45  ;;  %v179_v49 = vld [vmem:[#allocation3 + $0x4b0] sm:$0xff]  ;;  %v180_v50 = vld [vmem:[#allocation3 + $0x4b8] sm:$0xff] }
  0x5d   :  { %680 = vst [vmem:[#allocation6 + $0x450] sm:$0xff] %v424_v28  ;;  %681 = vst [vmem:[#allocation6 + $0x458] sm:$0xff] %v425_v29  ;;  %v181_v51 = vld [vmem:[#allocation3 + $0x4c0] sm:$0xff]  ;;  %v436_v52 = vmul.f32 %v904_v0, %v179_v49  ;;  %v437_v53 = vmul.f32 %v904_v0, %v180_v50  ;;  %v182_v55 = vld [vmem:[#allocation3 + $0x4c8] sm:$0xff] }
  0x5e   :  { %682 = vst [vmem:[#allocation6 + $0x460] sm:$0xff] %v426_v30  ;;  %683 = vst [vmem:[#allocation6 + $0x468] sm:$0xff] %v427_v34  ;;  %v438_v54 = vmul.f32 %v904_v0, %v181_v51  ;;  %v183_v56 = vld [vmem:[#allocation3 + $0x4d0] sm:$0xff]  ;;  %v184_v57 = vld [vmem:[#allocation3 + $0x4d8] sm:$0xff]  ;;  %v439_v58 = vmul.f32 %v904_v0, %v182_v55 }
  0x5f   :  { %684 = vst [vmem:[#allocation6 + $0x470] sm:$0xff] %v428_v35  ;;  %685 = vst [vmem:[#allocation6 + $0x478] sm:$0xff] %v429_v36  ;;  %v440_v59 = vmul.f32 %v904_v0, %v183_v56  ;;  %v441_v60 = vmul.f32 %v904_v0, %v184_v57  ;;  %v185_v61 = vld [vmem:[#allocation3 + $0x4e0] sm:$0xff]  ;;  %v186_v62 = vld [vmem:[#allocation3 + $0x4e8] sm:$0xff] }
  0x60   :  { %686 = vst [vmem:[#allocation6 + $0x480] sm:$0xff] %v430_v40  ;;  %687 = vst [vmem:[#allocation6 + $0x488] sm:$0xff] %v431_v41  ;;  %v187_v63 = vld [vmem:[#allocation3 + $0x4f0] sm:$0xff]  ;;  %v442_v1 = vmul.f32 %v904_v0, %v185_v61  ;;  %v443_v2 = vmul.f32 %v904_v0, %v186_v62  ;;  %v188_v4 = vld [vmem:[#allocation3 + $0x4f8] sm:$0xff] }
  0x61   :  { %688 = vst [vmem:[#allocation6 + $0x490] sm:$0xff] %v432_v42  ;;  %689 = vst [vmem:[#allocation6 + $0x498] sm:$0xff] %v433_v46  ;;  %v444_v3 = vmul.f32 %v904_v0, %v187_v63  ;;  %v189_v5 = vld [vmem:[#allocation3 + $0x500] sm:$0xff]  ;;  %v190_v6 = vld [vmem:[#allocation3 + $0x508] sm:$0xff]  ;;  %v445_v7 = vmul.f32 %v904_v0, %v188_v4 }
  0x62   :  { %690 = vst [vmem:[#allocation6 + $0x4a0] sm:$0xff] %v434_v47  ;;  %691 = vst [vmem:[#allocation6 + $0x4a8] sm:$0xff] %v435_v48  ;;  %v446_v8 = vmul.f32 %v904_v0, %v189_v5  ;;  %v447_v9 = vmul.f32 %v904_v0, %v190_v6  ;;  %v191_v10 = vld [vmem:[#allocation3 + $0x510] sm:$0xff]  ;;  %v192_v11 = vld [vmem:[#allocation3 + $0x518] sm:$0xff] }
  0x63   :  { %692 = vst [vmem:[#allocation6 + $0x4b0] sm:$0xff] %v436_v52  ;;  %693 = vst [vmem:[#allocation6 + $0x4b8] sm:$0xff] %v437_v53  ;;  %v193_v12 = vld [vmem:[#allocation3 + $0x520] sm:$0xff]  ;;  %v448_v13 = vmul.f32 %v904_v0, %v191_v10  ;;  %v449_v14 = vmul.f32 %v904_v0, %v192_v11  ;;  %v194_v16 = vld [vmem:[#allocation3 + $0x528] sm:$0xff] }
  0x64   :  { %694 = vst [vmem:[#allocation6 + $0x4c0] sm:$0xff] %v438_v54  ;;  %695 = vst [vmem:[#allocation6 + $0x4c8] sm:$0xff] %v439_v58  ;;  %v450_v15 = vmul.f32 %v904_v0, %v193_v12  ;;  %v195_v17 = vld [vmem:[#allocation3 + $0x530] sm:$0xff]  ;;  %v196_v18 = vld [vmem:[#allocation3 + $0x538] sm:$0xff]  ;;  %v451_v19 = vmul.f32 %v904_v0, %v194_v16 }
  0x65   :  { %696 = vst [vmem:[#allocation6 + $0x4d0] sm:$0xff] %v440_v59  ;;  %697 = vst [vmem:[#allocation6 + $0x4d8] sm:$0xff] %v441_v60  ;;  %v452_v20 = vmul.f32 %v904_v0, %v195_v17  ;;  %v453_v21 = vmul.f32 %v904_v0, %v196_v18  ;;  %v197_v22 = vld [vmem:[#allocation3 + $0x540] sm:$0xff]  ;;  %v198_v23 = vld [vmem:[#allocation3 + $0x548] sm:$0xff] }
  0x66   :  { %698 = vst [vmem:[#allocation6 + $0x4e0] sm:$0xff] %v442_v1  ;;  %699 = vst [vmem:[#allocation6 + $0x4e8] sm:$0xff] %v443_v2  ;;  %v199_v24 = vld [vmem:[#allocation3 + $0x550] sm:$0xff]  ;;  %v454_v25 = vmul.f32 %v904_v0, %v197_v22  ;;  %v455_v26 = vmul.f32 %v904_v0, %v198_v23  ;;  %v200_v28 = vld [vmem:[#allocation3 + $0x558] sm:$0xff] }
  0x67   :  { %700 = vst [vmem:[#allocation6 + $0x4f0] sm:$0xff] %v444_v3  ;;  %701 = vst [vmem:[#allocation6 + $0x4f8] sm:$0xff] %v445_v7  ;;  %v456_v27 = vmul.f32 %v904_v0, %v199_v24  ;;  %v201_v29 = vld [vmem:[#allocation3 + $0x560] sm:$0xff]  ;;  %v202_v30 = vld [vmem:[#allocation3 + $0x568] sm:$0xff]  ;;  %v457_v31 = vmul.f32 %v904_v0, %v200_v28 }
  0x68   :  { %702 = vst [vmem:[#allocation6 + $0x500] sm:$0xff] %v446_v8  ;;  %703 = vst [vmem:[#allocation6 + $0x508] sm:$0xff] %v447_v9  ;;  %v458_v32 = vmul.f32 %v904_v0, %v201_v29  ;;  %v459_v33 = vmul.f32 %v904_v0, %v202_v30  ;;  %v203_v34 = vld [vmem:[#allocation3 + $0x570] sm:$0xff]  ;;  %v204_v35 = vld [vmem:[#allocation3 + $0x578] sm:$0xff] }
  0x69   :  { %704 = vst [vmem:[#allocation6 + $0x510] sm:$0xff] %v448_v13  ;;  %705 = vst [vmem:[#allocation6 + $0x518] sm:$0xff] %v449_v14  ;;  %v205_v36 = vld [vmem:[#allocation3 + $0x580] sm:$0xff]  ;;  %v460_v37 = vmul.f32 %v904_v0, %v203_v34  ;;  %v461_v38 = vmul.f32 %v904_v0, %v204_v35  ;;  %v206_v40 = vld [vmem:[#allocation3 + $0x588] sm:$0xff] }
  0x6a   :  { %706 = vst [vmem:[#allocation6 + $0x520] sm:$0xff] %v450_v15  ;;  %707 = vst [vmem:[#allocation6 + $0x528] sm:$0xff] %v451_v19  ;;  %v462_v39 = vmul.f32 %v904_v0, %v205_v36  ;;  %v207_v41 = vld [vmem:[#allocation3 + $0x590] sm:$0xff]  ;;  %v208_v42 = vld [vmem:[#allocation3 + $0x598] sm:$0xff]  ;;  %v463_v43 = vmul.f32 %v904_v0, %v206_v40 }
  0x6b   :  { %708 = vst [vmem:[#allocation6 + $0x530] sm:$0xff] %v452_v20  ;;  %709 = vst [vmem:[#allocation6 + $0x538] sm:$0xff] %v453_v21  ;;  %v464_v44 = vmul.f32 %v904_v0, %v207_v41  ;;  %v465_v45 = vmul.f32 %v904_v0, %v208_v42  ;;  %v209_v46 = vld [vmem:[#allocation3 + $0x5a0] sm:$0xff]  ;;  %v210_v47 = vld [vmem:[#allocation3 + $0x5a8] sm:$0xff] }
  0x6c   :  { %710 = vst [vmem:[#allocation6 + $0x540] sm:$0xff] %v454_v25  ;;  %711 = vst [vmem:[#allocation6 + $0x548] sm:$0xff] %v455_v26  ;;  %v211_v48 = vld [vmem:[#allocation3 + $0x5b0] sm:$0xff]  ;;  %v466_v49 = vmul.f32 %v904_v0, %v209_v46  ;;  %v467_v50 = vmul.f32 %v904_v0, %v210_v47  ;;  %v212_v52 = vld [vmem:[#allocation3 + $0x5b8] sm:$0xff] }
  0x6d   :  { %712 = vst [vmem:[#allocation6 + $0x550] sm:$0xff] %v456_v27  ;;  %713 = vst [vmem:[#allocation6 + $0x558] sm:$0xff] %v457_v31  ;;  %v468_v51 = vmul.f32 %v904_v0, %v211_v48  ;;  %v213_v53 = vld [vmem:[#allocation3 + $0x5c0] sm:$0xff]  ;;  %v214_v54 = vld [vmem:[#allocation3 + $0x5c8] sm:$0xff]  ;;  %v469_v55 = vmul.f32 %v904_v0, %v212_v52 }
  0x6e   :  { %714 = vst [vmem:[#allocation6 + $0x560] sm:$0xff] %v458_v32  ;;  %715 = vst [vmem:[#allocation6 + $0x568] sm:$0xff] %v459_v33  ;;  %v470_v56 = vmul.f32 %v904_v0, %v213_v53  ;;  %v471_v57 = vmul.f32 %v904_v0, %v214_v54  ;;  %v215_v58 = vld [vmem:[#allocation3 + $0x5d0] sm:$0xff]  ;;  %v216_v59 = vld [vmem:[#allocation3 + $0x5d8] sm:$0xff] }
  0x6f   :  { %716 = vst [vmem:[#allocation6 + $0x570] sm:$0xff] %v460_v37  ;;  %717 = vst [vmem:[#allocation6 + $0x578] sm:$0xff] %v461_v38  ;;  %v217_v60 = vld [vmem:[#allocation3 + $0x5e0] sm:$0xff]  ;;  %v472_v61 = vmul.f32 %v904_v0, %v215_v58  ;;  %v473_v62 = vmul.f32 %v904_v0, %v216_v59  ;;  %v218_v1 = vld [vmem:[#allocation3 + $0x5e8] sm:$0xff] }
  0x70   :  { %718 = vst [vmem:[#allocation6 + $0x580] sm:$0xff] %v462_v39  ;;  %719 = vst [vmem:[#allocation6 + $0x588] sm:$0xff] %v463_v43  ;;  %v474_v63 = vmul.f32 %v904_v0, %v217_v60  ;;  %v219_v2 = vld [vmem:[#allocation3 + $0x5f0] sm:$0xff]  ;;  %v220_v3 = vld [vmem:[#allocation3 + $0x5f8] sm:$0xff]  ;;  %v475_v4 = vmul.f32 %v904_v0, %v218_v1 }
  0x71   :  { %720 = vst [vmem:[#allocation6 + $0x590] sm:$0xff] %v464_v44  ;;  %721 = vst [vmem:[#allocation6 + $0x598] sm:$0xff] %v465_v45  ;;  %v476_v5 = vmul.f32 %v904_v0, %v219_v2  ;;  %v477_v6 = vmul.f32 %v904_v0, %v220_v3  ;;  %v221_v7 = vld [vmem:[#allocation3 + $0x600] sm:$0xff]  ;;  %v222_v8 = vld [vmem:[#allocation3 + $0x608] sm:$0xff] }
  0x72   :  { %722 = vst [vmem:[#allocation6 + $0x5a0] sm:$0xff] %v466_v49  ;;  %723 = vst [vmem:[#allocation6 + $0x5a8] sm:$0xff] %v467_v50  ;;  %v223_v9 = vld [vmem:[#allocation3 + $0x610] sm:$0xff]  ;;  %v478_v10 = vmul.f32 %v904_v0, %v221_v7  ;;  %v479_v11 = vmul.f32 %v904_v0, %v222_v8  ;;  %v224_v13 = vld [vmem:[#allocation3 + $0x618] sm:$0xff] }
  0x73   :  { %724 = vst [vmem:[#allocation6 + $0x5b0] sm:$0xff] %v468_v51  ;;  %725 = vst [vmem:[#allocation6 + $0x5b8] sm:$0xff] %v469_v55  ;;  %v480_v12 = vmul.f32 %v904_v0, %v223_v9  ;;  %v225_v14 = vld [vmem:[#allocation3 + $0x620] sm:$0xff]  ;;  %v226_v15 = vld [vmem:[#allocation3 + $0x628] sm:$0xff]  ;;  %v481_v16 = vmul.f32 %v904_v0, %v224_v13 }
  0x74   :  { %726 = vst [vmem:[#allocation6 + $0x5c0] sm:$0xff] %v470_v56  ;;  %727 = vst [vmem:[#allocation6 + $0x5c8] sm:$0xff] %v471_v57  ;;  %v482_v17 = vmul.f32 %v904_v0, %v225_v14  ;;  %v483_v18 = vmul.f32 %v904_v0, %v226_v15  ;;  %v227_v19 = vld [vmem:[#allocation3 + $0x630] sm:$0xff]  ;;  %v228_v20 = vld [vmem:[#allocation3 + $0x638] sm:$0xff] }
  0x75   :  { %728 = vst [vmem:[#allocation6 + $0x5d0] sm:$0xff] %v472_v61  ;;  %729 = vst [vmem:[#allocation6 + $0x5d8] sm:$0xff] %v473_v62  ;;  %v229_v21 = vld [vmem:[#allocation3 + $0x640] sm:$0xff]  ;;  %v484_v22 = vmul.f32 %v904_v0, %v227_v19  ;;  %v485_v23 = vmul.f32 %v904_v0, %v228_v20  ;;  %v230_v25 = vld [vmem:[#allocation3 + $0x648] sm:$0xff] }
  0x76   :  { %730 = vst [vmem:[#allocation6 + $0x5e0] sm:$0xff] %v474_v63  ;;  %731 = vst [vmem:[#allocation6 + $0x5e8] sm:$0xff] %v475_v4  ;;  %v486_v24 = vmul.f32 %v904_v0, %v229_v21  ;;  %v231_v26 = vld [vmem:[#allocation3 + $0x650] sm:$0xff]  ;;  %v232_v27 = vld [vmem:[#allocation3 + $0x658] sm:$0xff]  ;;  %v487_v28 = vmul.f32 %v904_v0, %v230_v25 }
  0x77   :  { %732 = vst [vmem:[#allocation6 + $0x5f0] sm:$0xff] %v476_v5  ;;  %733 = vst [vmem:[#allocation6 + $0x5f8] sm:$0xff] %v477_v6  ;;  %v488_v29 = vmul.f32 %v904_v0, %v231_v26  ;;  %v489_v30 = vmul.f32 %v904_v0, %v232_v27  ;;  %v233_v31 = vld [vmem:[#allocation3 + $0x660] sm:$0xff]  ;;  %v234_v32 = vld [vmem:[#allocation3 + $0x668] sm:$0xff] }
  0x78   :  { %734 = vst [vmem:[#allocation6 + $0x600] sm:$0xff] %v478_v10  ;;  %735 = vst [vmem:[#allocation6 + $0x608] sm:$0xff] %v479_v11  ;;  %v235_v33 = vld [vmem:[#allocation3 + $0x670] sm:$0xff]  ;;  %v490_v34 = vmul.f32 %v904_v0, %v233_v31  ;;  %v491_v35 = vmul.f32 %v904_v0, %v234_v32  ;;  %v236_v37 = vld [vmem:[#allocation3 + $0x678] sm:$0xff] }
  0x79   :  { %736 = vst [vmem:[#allocation6 + $0x610] sm:$0xff] %v480_v12  ;;  %737 = vst [vmem:[#allocation6 + $0x618] sm:$0xff] %v481_v16  ;;  %v492_v36 = vmul.f32 %v904_v0, %v235_v33  ;;  %v237_v38 = vld [vmem:[#allocation3 + $0x680] sm:$0xff]  ;;  %v238_v39 = vld [vmem:[#allocation3 + $0x688] sm:$0xff]  ;;  %v493_v40 = vmul.f32 %v904_v0, %v236_v37 }
  0x7a   :  { %738 = vst [vmem:[#allocation6 + $0x620] sm:$0xff] %v482_v17  ;;  %739 = vst [vmem:[#allocation6 + $0x628] sm:$0xff] %v483_v18  ;;  %v494_v41 = vmul.f32 %v904_v0, %v237_v38  ;;  %v495_v42 = vmul.f32 %v904_v0, %v238_v39  ;;  %v239_v43 = vld [vmem:[#allocation3 + $0x690] sm:$0xff]  ;;  %v240_v44 = vld [vmem:[#allocation3 + $0x698] sm:$0xff] }
  0x7b   :  { %740 = vst [vmem:[#allocation6 + $0x630] sm:$0xff] %v484_v22  ;;  %741 = vst [vmem:[#allocation6 + $0x638] sm:$0xff] %v485_v23  ;;  %v241_v45 = vld [vmem:[#allocation3 + $0x6a0] sm:$0xff]  ;;  %v496_v46 = vmul.f32 %v904_v0, %v239_v43  ;;  %v497_v47 = vmul.f32 %v904_v0, %v240_v44  ;;  %v242_v49 = vld [vmem:[#allocation3 + $0x6a8] sm:$0xff] }
  0x7c   :  { %742 = vst [vmem:[#allocation6 + $0x640] sm:$0xff] %v486_v24  ;;  %743 = vst [vmem:[#allocation6 + $0x648] sm:$0xff] %v487_v28  ;;  %v498_v48 = vmul.f32 %v904_v0, %v241_v45  ;;  %v243_v50 = vld [vmem:[#allocation3 + $0x6b0] sm:$0xff]  ;;  %v244_v51 = vld [vmem:[#allocation3 + $0x6b8] sm:$0xff]  ;;  %v499_v52 = vmul.f32 %v904_v0, %v242_v49 }
  0x7d   :  { %744 = vst [vmem:[#allocation6 + $0x650] sm:$0xff] %v488_v29  ;;  %745 = vst [vmem:[#allocation6 + $0x658] sm:$0xff] %v489_v30  ;;  %v500_v53 = vmul.f32 %v904_v0, %v243_v50  ;;  %v501_v54 = vmul.f32 %v904_v0, %v244_v51  ;;  %v245_v55 = vld [vmem:[#allocation3 + $0x6c0] sm:$0xff]  ;;  %v246_v56 = vld [vmem:[#allocation3 + $0x6c8] sm:$0xff] }
  0x7e   :  { %746 = vst [vmem:[#allocation6 + $0x660] sm:$0xff] %v490_v34  ;;  %747 = vst [vmem:[#allocation6 + $0x668] sm:$0xff] %v491_v35  ;;  %v247_v57 = vld [vmem:[#allocation3 + $0x6d0] sm:$0xff]  ;;  %v502_v58 = vmul.f32 %v904_v0, %v245_v55  ;;  %v503_v59 = vmul.f32 %v904_v0, %v246_v56  ;;  %v248_v61 = vld [vmem:[#allocation3 + $0x6d8] sm:$0xff] }
  0x7f   :  { %748 = vst [vmem:[#allocation6 + $0x670] sm:$0xff] %v492_v36  ;;  %749 = vst [vmem:[#allocation6 + $0x678] sm:$0xff] %v493_v40  ;;  %v504_v60 = vmul.f32 %v904_v0, %v247_v57  ;;  %v249_v62 = vld [vmem:[#allocation3 + $0x6e0] sm:$0xff]  ;;  %v250_v63 = vld [vmem:[#allocation3 + $0x6e8] sm:$0xff]  ;;  %v505_v1 = vmul.f32 %v904_v0, %v248_v61 }
  0x80   :  { %750 = vst [vmem:[#allocation6 + $0x680] sm:$0xff] %v494_v41  ;;  %751 = vst [vmem:[#allocation6 + $0x688] sm:$0xff] %v495_v42  ;;  %v506_v2 = vmul.f32 %v904_v0, %v249_v62  ;;  %v507_v3 = vmul.f32 %v904_v0, %v250_v63  ;;  %v251_v4 = vld [vmem:[#allocation3 + $0x6f0] sm:$0xff]  ;;  %v252_v5 = vld [vmem:[#allocation3 + $0x6f8] sm:$0xff] }
  0x81   :  { %752 = vst [vmem:[#allocation6 + $0x690] sm:$0xff] %v496_v46  ;;  %753 = vst [vmem:[#allocation6 + $0x698] sm:$0xff] %v497_v47  ;;  %v253_v6 = vld [vmem:[#allocation3 + $0x700] sm:$0xff]  ;;  %v508_v7 = vmul.f32 %v904_v0, %v251_v4  ;;  %v509_v8 = vmul.f32 %v904_v0, %v252_v5  ;;  %v254_v10 = vld [vmem:[#allocation3 + $0x708] sm:$0xff] }
  0x82   :  { %754 = vst [vmem:[#allocation6 + $0x6a0] sm:$0xff] %v498_v48  ;;  %755 = vst [vmem:[#allocation6 + $0x6a8] sm:$0xff] %v499_v52  ;;  %v510_v9 = vmul.f32 %v904_v0, %v253_v6  ;;  %v255_v11 = vld [vmem:[#allocation3 + $0x710] sm:$0xff]  ;;  %v256_v12 = vld [vmem:[#allocation3 + $0x718] sm:$0xff]  ;;  %v511_v13 = vmul.f32 %v904_v0, %v254_v10 }
  0x83   :  { %756 = vst [vmem:[#allocation6 + $0x6b0] sm:$0xff] %v500_v53  ;;  %757 = vst [vmem:[#allocation6 + $0x6b8] sm:$0xff] %v501_v54  ;;  %v512_v14 = vmul.f32 %v904_v0, %v255_v11  ;;  %v513_v15 = vmul.f32 %v904_v0, %v256_v12  ;;  %v257_v16 = vld [vmem:[#allocation3 + $0x720] sm:$0xff]  ;;  %v258_v17 = vld [vmem:[#allocation3 + $0x728] sm:$0xff] }
  0x84   :  { %758 = vst [vmem:[#allocation6 + $0x6c0] sm:$0xff] %v502_v58  ;;  %759 = vst [vmem:[#allocation6 + $0x6c8] sm:$0xff] %v503_v59  ;;  %v259_v18 = vld [vmem:[#allocation3 + $0x730] sm:$0xff]  ;;  %v514_v19 = vmul.f32 %v904_v0, %v257_v16  ;;  %v515_v20 = vmul.f32 %v904_v0, %v258_v17  ;;  %v260_v22 = vld [vmem:[#allocation3 + $0x738] sm:$0xff] }
  0x85   :  { %760 = vst [vmem:[#allocation6 + $0x6d0] sm:$0xff] %v504_v60  ;;  %761 = vst [vmem:[#allocation6 + $0x6d8] sm:$0xff] %v505_v1  ;;  %v516_v21 = vmul.f32 %v904_v0, %v259_v18  ;;  %v261_v23 = vld [vmem:[#allocation3 + $0x740] sm:$0xff]  ;;  %v262_v24 = vld [vmem:[#allocation3 + $0x748] sm:$0xff]  ;;  %v517_v25 = vmul.f32 %v904_v0, %v260_v22 }
  0x86   :  { %762 = vst [vmem:[#allocation6 + $0x6e0] sm:$0xff] %v506_v2  ;;  %763 = vst [vmem:[#allocation6 + $0x6e8] sm:$0xff] %v507_v3  ;;  %v518_v26 = vmul.f32 %v904_v0, %v261_v23  ;;  %v519_v27 = vmul.f32 %v904_v0, %v262_v24  ;;  %v263_v28 = vld [vmem:[#allocation3 + $0x750] sm:$0xff]  ;;  %v264_v29 = vld [vmem:[#allocation3 + $0x758] sm:$0xff] }
  0x87   :  { %764 = vst [vmem:[#allocation6 + $0x6f0] sm:$0xff] %v508_v7  ;;  %765 = vst [vmem:[#allocation6 + $0x6f8] sm:$0xff] %v509_v8  ;;  %v265_v30 = vld [vmem:[#allocation3 + $0x760] sm:$0xff]  ;;  %v520_v31 = vmul.f32 %v904_v0, %v263_v28  ;;  %v521_v32 = vmul.f32 %v904_v0, %v264_v29  ;;  %v266_v34 = vld [vmem:[#allocation3 + $0x768] sm:$0xff] }
  0x88   :  { %766 = vst [vmem:[#allocation6 + $0x700] sm:$0xff] %v510_v9  ;;  %767 = vst [vmem:[#allocation6 + $0x708] sm:$0xff] %v511_v13  ;;  %v522_v33 = vmul.f32 %v904_v0, %v265_v30  ;;  %v267_v35 = vld [vmem:[#allocation3 + $0x770] sm:$0xff]  ;;  %v268_v36 = vld [vmem:[#allocation3 + $0x778] sm:$0xff]  ;;  %v523_v37 = vmul.f32 %v904_v0, %v266_v34 }
  0x89   :  { %768 = vst [vmem:[#allocation6 + $0x710] sm:$0xff] %v512_v14  ;;  %769 = vst [vmem:[#allocation6 + $0x718] sm:$0xff] %v513_v15  ;;  %v524_v38 = vmul.f32 %v904_v0, %v267_v35  ;;  %v525_v39 = vmul.f32 %v904_v0, %v268_v36  ;;  %v269_v40 = vld [vmem:[#allocation3 + $0x780] sm:$0xff]  ;;  %v270_v41 = vld [vmem:[#allocation3 + $0x788] sm:$0xff] }
  0x8a   :  { %770 = vst [vmem:[#allocation6 + $0x720] sm:$0xff] %v514_v19  ;;  %771 = vst [vmem:[#allocation6 + $0x728] sm:$0xff] %v515_v20  ;;  %v271_v42 = vld [vmem:[#allocation3 + $0x790] sm:$0xff]  ;;  %v526_v43 = vmul.f32 %v904_v0, %v269_v40  ;;  %v527_v44 = vmul.f32 %v904_v0, %v270_v41  ;;  %v272_v46 = vld [vmem:[#allocation3 + $0x798] sm:$0xff] }
  0x8b   :  { %772 = vst [vmem:[#allocation6 + $0x730] sm:$0xff] %v516_v21  ;;  %773 = vst [vmem:[#allocation6 + $0x738] sm:$0xff] %v517_v25  ;;  %v528_v45 = vmul.f32 %v904_v0, %v271_v42  ;;  %v273_v47 = vld [vmem:[#allocation3 + $0x7a0] sm:$0xff]  ;;  %v274_v48 = vld [vmem:[#allocation3 + $0x7a8] sm:$0xff]  ;;  %v529_v49 = vmul.f32 %v904_v0, %v272_v46 }
  0x8c   :  { %774 = vst [vmem:[#allocation6 + $0x740] sm:$0xff] %v518_v26  ;;  %775 = vst [vmem:[#allocation6 + $0x748] sm:$0xff] %v519_v27  ;;  %v530_v50 = vmul.f32 %v904_v0, %v273_v47  ;;  %v531_v51 = vmul.f32 %v904_v0, %v274_v48  ;;  %v275_v52 = vld [vmem:[#allocation3 + $0x7b0] sm:$0xff]  ;;  %v276_v53 = vld [vmem:[#allocation3 + $0x7b8] sm:$0xff] }
  0x8d   :  { %776 = vst [vmem:[#allocation6 + $0x750] sm:$0xff] %v520_v31  ;;  %777 = vst [vmem:[#allocation6 + $0x758] sm:$0xff] %v521_v32  ;;  %v277_v54 = vld [vmem:[#allocation3 + $0x7c0] sm:$0xff]  ;;  %v532_v55 = vmul.f32 %v904_v0, %v275_v52  ;;  %v533_v56 = vmul.f32 %v904_v0, %v276_v53  ;;  %v278_v58 = vld [vmem:[#allocation3 + $0x7c8] sm:$0xff] }
  0x8e   :  { %778 = vst [vmem:[#allocation6 + $0x760] sm:$0xff] %v522_v33  ;;  %779 = vst [vmem:[#allocation6 + $0x768] sm:$0xff] %v523_v37  ;;  %v534_v57 = vmul.f32 %v904_v0, %v277_v54  ;;  %v279_v59 = vld [vmem:[#allocation3 + $0x7d0] sm:$0xff]  ;;  %v280_v60 = vld [vmem:[#allocation3 + $0x7d8] sm:$0xff]  ;;  %v535_v61 = vmul.f32 %v904_v0, %v278_v58 }
  0x8f   :  { %780 = vst [vmem:[#allocation6 + $0x770] sm:$0xff] %v524_v38  ;;  %781 = vst [vmem:[#allocation6 + $0x778] sm:$0xff] %v525_v39  ;;  %v536_v62 = vmul.f32 %v904_v0, %v279_v59  ;;  %v537_v63 = vmul.f32 %v904_v0, %v280_v60  ;;  %v281_v1 = vld [vmem:[#allocation3 + $0x7e0] sm:$0xff]  ;;  %v282_v2 = vld [vmem:[#allocation3 + $0x7e8] sm:$0xff] }
  0x90   :  { %782 = vst [vmem:[#allocation6 + $0x780] sm:$0xff] %v526_v43  ;;  %783 = vst [vmem:[#allocation6 + $0x788] sm:$0xff] %v527_v44  ;;  %v283_v3 = vld [vmem:[#allocation3 + $0x7f0] sm:$0xff]  ;;  %v538_v4 = vmul.f32 %v904_v0, %v281_v1  ;;  %v539_v5 = vmul.f32 %v904_v0, %v282_v2  ;;  %v284_v7 = vld [vmem:[#allocation3 + $0x7f8] sm:$0xff] }
  0x91   :  { %784 = vst [vmem:[#allocation6 + $0x790] sm:$0xff] %v528_v45  ;;  %785 = vst [vmem:[#allocation6 + $0x798] sm:$0xff] %v529_v49  ;;  %v540_v6 = vmul.f32 %v904_v0, %v283_v3  ;;  %v541_v8 = vmul.f32 %v904_v0, %v284_v7 }
  0x92   :  { %786 = vst [vmem:[#allocation6 + $0x7a0] sm:$0xff] %v530_v50  ;;  %787 = vst [vmem:[#allocation6 + $0x7a8] sm:$0xff] %v531_v51 }
  0x93   :  { %788 = vst [vmem:[#allocation6 + $0x7b0] sm:$0xff] %v532_v55  ;;  %789 = vst [vmem:[#allocation6 + $0x7b8] sm:$0xff] %v533_v56 }
  0x94   :  { %790 = vst [vmem:[#allocation6 + $0x7c0] sm:$0xff] %v534_v57  ;;  %791 = vst [vmem:[#allocation6 + $0x7c8] sm:$0xff] %v535_v61 }
  0x95   :  { %792 = vst [vmem:[#allocation6 + $0x7d0] sm:$0xff] %v536_v62  ;;  %793 = vst [vmem:[#allocation6 + $0x7d8] sm:$0xff] %v537_v63 }
  0x96   :  { %794 = vst [vmem:[#allocation6 + $0x7e0] sm:$0xff] %v538_v4  ;;  %795 = vst [vmem:[#allocation6 + $0x7e8] sm:$0xff] %v539_v5 }
  0x97   :  { %796 = vst [vmem:[#allocation6 + $0x7f0] sm:$0xff] %v540_v6  ;;  %797 = vst [vmem:[#allocation6 + $0x7f8] sm:$0xff] %v541_v8 }
  0x98   :  { %852 = shalt.err (!%p849_p12)
}
  0x99   :  { %s853_s29 = scalar_lea.hbm %s1179_s2, 32768 }
  0x9a   :  { %p854_p13 = scmp.ne.s32.totalorder %s1179_s2, %s853_s29  ;;  %p857_p0 = scmp.lt.u32.totalorder %s853_s29, %s1179_s2 }
  0x9c   :  { %p859_p1 = pnand %p857_p0, %p854_p13 }
  0x9e   :  { %862 = shalt.err (!%p859_p1)
}
  0x9f   :  { %809 = dma.vmem_to_hbm [thread:$0]  %s804_s1, 32768, %s1179_s2, [#allocation5], %s868_s19, %s868_s19, %s869_s20  }
  0xa0   :  { %865 = dma.done.wait [#allocation5], 32768  }
  0xa1   :  { %866 = vsyncadd [#allocation5], 4294934528 }
  0xa2   :  { %813 = vsyncpa [#allocation4], 1 }
  0xa3   :  { %814 = vsyncpa [#allocation5], 1 }

</bundles_post_ra>
